<compile_context>
chip_gen: v6e
topology: v6e:2x2x1
jax: 0.10.0
libtpu: 0.0.40
codegen_flags: <defaults>
</compile_context>

<pallas_src>
import jax
import jax.numpy as jnp
from jax import lax
from jax.experimental import pallas as pl
from jax.experimental.pallas import tpu as pltpu

_LANES = 128      # vreg lane width (batch maps here)
_SUBLANES = 8     # f32 sublane count
_HIDDEN = 32      # hidden width of the MLP
_MAX_STRIP = 32   # rows per inner compute strip (~4 vregs live per array)


def _round_up(a, b):
    return ((a + b - 1) // b) * b


def _make_kernel(n_strips, strip, compute_dtype):
    """Build the kernel for a fixed (block_rows // strip, strip, dtype)."""
    f32 = (compute_dtype == jnp.float32)

    def kernel(x_ref, w1_ref, b1_ref, c_ref, db_ref, p0_ref):
        # x_ref  : [block_rows, 128] f32 VMEM -- lane-major batch tile
        # w1_ref : [32] f32 SMEM -- Linear(1,32) weight
        # b1_ref : [32] f32 SMEM -- Linear(1,32) bias
        # c_ref  : [32] f32 SMEM -- w2[:,1] - w2[:,0]
        # db_ref : [1]  f32 SMEM -- b2[1] - b2[0]
        # p0_ref : [block_rows, 128] f32 VMEM -- softmax prob of class 0
        db = db_ref[0]

        def strip_body(s, carry):
            row = pl.multiple_of(s * strip, strip)
            x = x_ref[pl.ds(row, strip), :]
            if not f32:
                x = x.astype(compute_dtype)
            # Single accumulator: 2-class softmax depends only on l1 - l0.
            if f32:
                d = jnp.full(x.shape, db, jnp.float32)
            else:
                d = jnp.zeros(x.shape, compute_dtype)
            for j in range(_HIDDEN):           # fully unrolled VPU FMAs
                w = w1_ref[j]
                b = b1_ref[j]
                c = c_ref[j]
                if not f32:
                    w = w.astype(compute_dtype)
                    b = b.astype(compute_dtype)
                    c = c.astype(compute_dtype)
                h = jnp.maximum(x * w + b, 0)  # Linear(1,32)[j] + ReLU
                d = d + h * c                  # Linear(32,2) logit-diff contrib
            diff = d if f32 else d.astype(jnp.float32) + db
            # 2-class softmax == sigmoid(l1 - l0); reciprocal goes to the EUP.
            p0 = pl.reciprocal(1.0 + jnp.exp(diff), approx=True)
            p0_ref[pl.ds(row, strip), :] = p0
            return carry

        if n_strips == 1:
            strip_body(0, 0)
        else:
            lax.fori_loop(0, n_strips, strip_body, 0, unroll=False)

    return kernel


def region_classifier_forward(x, w1, b1, w2, b2, *, max_block_rows=1024,
                              compute_dtype=jnp.float32):
    """x: [N, 1] (or [N]) float32 -> probs: [N, 2] float32.

    Weights use the y = x @ W + b convention: w1 [1,32], b1 [1,32],
    w2 [32,2], b2 [1,2] (transposed relative to torch.nn.Linear storage).
    compute_dtype=jnp.bfloat16 enables the faster VPU path on v6e/v7x
    (do not use on v5e; accuracy ~1e-3).
    """
    n = x.shape[0]

    # ---- block / strip sizing --------------------------------------------
    rows_raw = max(1, -(-n // _LANES))
    if rows_raw >= 2 * _SUBLANES:
        # Ensure >=2 grid steps so v7x's second TensorCore gets work.
        target = _round_up(-(-rows_raw // 2), _SUBLANES)
    else:
        target = _round_up(rows_raw, _SUBLANES)
    block_rows = min(max_block_rows, target)
    strip = min(_MAX_STRIP, block_rows)
    block_rows = _round_up(block_rows, strip)       # strips tile the block
    m = _round_up(rows_raw, block_rows)
    n_pad = m * _LANES

    # ---- layout plumbing: batch goes lane-major --------------------------
    # (If the consumer can take the lane-major [M,128] plane directly, skip
    #  the pad/stack passes below to save an extra HBM read+write pass.)
    xf = jnp.ravel(x).astype(jnp.float32)
    xf = jnp.pad(xf, (0, n_pad - n))
    x2 = xf.reshape(m, _LANES)                       # [M, 128] lane-dense

    # ---- weight prep: fold the 2-class head into a single diff vector ----
    w1f = jnp.ravel(w1).astype(jnp.float32)                      # [32]
    b1f = jnp.ravel(b1).astype(jnp.float32)                      # [32]
    w2f = jnp.asarray(w2, jnp.float32).reshape(_HIDDEN, 2)
    c = w2f[:, 1] - w2f[:, 0]                                    # [32]
    b2f = jnp.ravel(b2).astype(jnp.float32)
    db = (b2f[1] - b2f[0]).reshape(1)                            # [1]

    def smem_spec(shape):
        # Constant index_map: tiny weight arrays are not re-DMA'd per step.
        return pl.BlockSpec(shape, lambda i: (0,) * len(shape),
                            memory_space=pltpu.MemorySpace.SMEM)

    tile = pl.BlockSpec((block_rows, _LANES), lambda i: (i, 0))
    kernel = _make_kernel(block_rows // strip, strip, compute_dtype)

    p0 = pl.pallas_call(
        kernel,
        out_shape=jax.ShapeDtypeStruct((m, _LANES), jnp.float32),
        grid=(m // block_rows,),
        in_specs=[
            tile,                       # x tile, double-buffered by BlockSpec
            smem_spec((_HIDDEN,)),      # w1
            smem_spec((_HIDDEN,)),      # b1
            smem_spec((_HIDDEN,)),      # c  = w2[:,1] - w2[:,0]
            smem_spec((1,)),            # db = b2[1] - b2[0]
        ],
        out_specs=tile,                 # lane-dense, unmasked vst
        compiler_params=pltpu.CompilerParams(
            dimension_semantics=("parallel",)),   # megacore sharding on v7x
    )(x2, w1f, b1f, c, db)

    # Reassemble [N, 2]: drop padding; p1 = 1 - p0 built outside the kernel.
    p0f = p0.reshape(-1)[:n]
    return jnp.stack([p0f, 1.0 - p0f], axis=1)


def init_params(key):
    """Deterministic init matching torch.nn.Linear shapes (uniform +-1/sqrt(fan_in))."""
    k1, k2, k3, k4 = jax.random.split(key, 4)
    # Linear(1, 32): fan_in = 1
    w1 = jax.random.uniform(k1, (1, _HIDDEN), jnp.float32, minval=-1.0, maxval=1.0)
    b1 = jax.random.uniform(k2, (1, _HIDDEN), jnp.float32, minval=-1.0, maxval=1.0)
    # Linear(32, 2): fan_in = 32
    bound = 1.0 / jnp.sqrt(float(_HIDDEN))
    w2 = jax.random.uniform(k3, (_HIDDEN, 2), jnp.float32, minval=-bound, maxval=bound)
    b2 = jax.random.uniform(k4, (1, 2), jnp.float32, minval=-bound, maxval=bound)
    return w1, b1, w2, b2


if __name__ == "__main__":
    key = jax.random.PRNGKey(0)
    kx, kp = jax.random.split(key)
    w1, b1, w2, b2 = init_params(kp)

    def reference(x):
        h = jnp.maximum(x @ w1 + b1, 0.0)
        return jax.nn.softmax(h @ w2 + b2, axis=1)

    # N=200 exercises lane padding; N=2048 exercises the >=2-grid-step path.
    for n in (200, 2048):
        x = jax.random.normal(jax.random.fold_in(kx, n), (n, 1), jnp.float32)
        probs = region_classifier_forward(x, w1, b1, w2, b2)
        jax.block_until_ready(probs)
        probs_ref = reference(x)
        assert probs.shape == (n, 2)
        # pl.reciprocal(approx=True) is ~1e-3/1e-4 accurate -> loosened tol.
        assert jnp.allclose(probs, probs_ref, atol=2e-3, rtol=2e-3)
        assert jnp.allclose(jnp.sum(probs, axis=1), 1.0, atol=1e-6)

    print("KERNEL_OK")
</pallas_src>

<mosaic_0001>
module attributes {stable_mosaic.version = 11 : i64} {
  func.func @kernel(%arg0: i32, %arg1: memref<8x128xf32, #tpu.memory_space<vmem>>, %arg2: memref<32xf32, #tpu.memory_space<smem>>, %arg3: memref<32xf32, #tpu.memory_space<smem>>, %arg4: memref<32xf32, #tpu.memory_space<smem>>, %arg5: memref<1xf32, #tpu.memory_space<smem>>, %arg6: memref<8x128xf32, #tpu.memory_space<vmem>>) attributes {dimension_semantics = [#tpu.dimension_semantics<parallel>], iteration_bounds = array<i64: 1>, scalar_prefetch = 0 : i64, scratch_operands = 0 : i64, tpu.core_type = #tpu.core_type<tc>, window_params = [{transform_indices = @transform_0, window_bounds = array<i64: 8, 128>}, {transform_indices = @transform_1, window_bounds = array<i64: 32>}, {transform_indices = @transform_2, window_bounds = array<i64: 32>}, {transform_indices = @transform_3, window_bounds = array<i64: 32>}, {transform_indices = @transform_4, window_bounds = array<i64: 1>}, {transform_indices = @transform_5, window_bounds = array<i64: 8, 128>}]} {
    %c0 = arith.constant 0 : index
    %0 = memref.load %arg5[%c0] : memref<1xf32, #tpu.memory_space<smem>>
    %c0_i32 = arith.constant 0 : i32
    %1 = tpu.assume_multiple %c0_i32, 8 : i32
    %2 = arith.index_cast %1 : i32 to index
    %c0_0 = arith.constant 0 : index
    %3 = vector.load %arg1[%2, %c0_0] : memref<8x128xf32, #tpu.memory_space<vmem>>, vector<8x128xf32>
    %4 = vector.broadcast %0 : f32 to vector<8x128xf32>
    %c0_1 = arith.constant 0 : index
    %5 = memref.load %arg2[%c0_1] : memref<32xf32, #tpu.memory_space<smem>>
    %c0_2 = arith.constant 0 : index
    %6 = memref.load %arg3[%c0_2] : memref<32xf32, #tpu.memory_space<smem>>
    %c0_3 = arith.constant 0 : index
    %7 = memref.load %arg4[%c0_3] : memref<32xf32, #tpu.memory_space<smem>>
    %8 = vector.broadcast %5 : f32 to vector<8x128xf32>
    %9 = arith.mulf %3, %8 : vector<8x128xf32>
    %10 = vector.broadcast %6 : f32 to vector<8x128xf32>
    %11 = arith.addf %9, %10 : vector<8x128xf32>
    %cst = arith.constant 0.000000e+00 : f32
    %12 = vector.broadcast %cst : f32 to vector<8x128xf32>
    %13 = arith.maximumf %11, %12 : vector<8x128xf32>
    %14 = vector.broadcast %7 : f32 to vector<8x128xf32>
    %15 = arith.mulf %13, %14 : vector<8x128xf32>
    %16 = arith.addf %4, %15 : vector<8x128xf32>
    %c1 = arith.constant 1 : index
    %17 = memref.load %arg2[%c1] : memref<32xf32, #tpu.memory_space<smem>>
    %c1_4 = arith.constant 1 : index
    %18 = memref.load %arg3[%c1_4] : memref<32xf32, #tpu.memory_space<smem>>
    %c1_5 = arith.constant 1 : index
    %19 = memref.load %arg4[%c1_5] : memref<32xf32, #tpu.memory_space<smem>>
    %20 = vector.broadcast %17 : f32 to vector<8x128xf32>
    %21 = arith.mulf %3, %20 : vector<8x128xf32>
    %22 = vector.broadcast %18 : f32 to vector<8x128xf32>
    %23 = arith.addf %21, %22 : vector<8x128xf32>
    %cst_6 = arith.constant 0.000000e+00 : f32
    %24 = vector.broadcast %cst_6 : f32 to vector<8x128xf32>
    %25 = arith.maximumf %23, %24 : vector<8x128xf32>
    %26 = vector.broadcast %19 : f32 to vector<8x128xf32>
    %27 = arith.mulf %25, %26 : vector<8x128xf32>
    %28 = arith.addf %16, %27 : vector<8x128xf32>
    %c2 = arith.constant 2 : index
    %29 = memref.load %arg2[%c2] : memref<32xf32, #tpu.memory_space<smem>>
    %c2_7 = arith.constant 2 : index
    %30 = memref.load %arg3[%c2_7] : memref<32xf32, #tpu.memory_space<smem>>
    %c2_8 = arith.constant 2 : index
    %31 = memref.load %arg4[%c2_8] : memref<32xf32, #tpu.memory_space<smem>>
    %32 = vector.broadcast %29 : f32 to vector<8x128xf32>
    %33 = arith.mulf %3, %32 : vector<8x128xf32>
    %34 = vector.broadcast %30 : f32 to vector<8x128xf32>
    %35 = arith.addf %33, %34 : vector<8x128xf32>
    %cst_9 = arith.constant 0.000000e+00 : f32
    %36 = vector.broadcast %cst_9 : f32 to vector<8x128xf32>
    %37 = arith.maximumf %35, %36 : vector<8x128xf32>
    %38 = vector.broadcast %31 : f32 to vector<8x128xf32>
    %39 = arith.mulf %37, %38 : vector<8x128xf32>
    %40 = arith.addf %28, %39 : vector<8x128xf32>
    %c3 = arith.constant 3 : index
    %41 = memref.load %arg2[%c3] : memref<32xf32, #tpu.memory_space<smem>>
    %c3_10 = arith.constant 3 : index
    %42 = memref.load %arg3[%c3_10] : memref<32xf32, #tpu.memory_space<smem>>
    %c3_11 = arith.constant 3 : index
    %43 = memref.load %arg4[%c3_11] : memref<32xf32, #tpu.memory_space<smem>>
    %44 = vector.broadcast %41 : f32 to vector<8x128xf32>
    %45 = arith.mulf %3, %44 : vector<8x128xf32>
    %46 = vector.broadcast %42 : f32 to vector<8x128xf32>
    %47 = arith.addf %45, %46 : vector<8x128xf32>
    %cst_12 = arith.constant 0.000000e+00 : f32
    %48 = vector.broadcast %cst_12 : f32 to vector<8x128xf32>
    %49 = arith.maximumf %47, %48 : vector<8x128xf32>
    %50 = vector.broadcast %43 : f32 to vector<8x128xf32>
    %51 = arith.mulf %49, %50 : vector<8x128xf32>
    %52 = arith.addf %40, %51 : vector<8x128xf32>
    %c4 = arith.constant 4 : index
    %53 = memref.load %arg2[%c4] : memref<32xf32, #tpu.memory_space<smem>>
    %c4_13 = arith.constant 4 : index
    %54 = memref.load %arg3[%c4_13] : memref<32xf32, #tpu.memory_space<smem>>
    %c4_14 = arith.constant 4 : index
    %55 = memref.load %arg4[%c4_14] : memref<32xf32, #tpu.memory_space<smem>>
    %56 = vector.broadcast %53 : f32 to vector<8x128xf32>
    %57 = arith.mulf %3, %56 : vector<8x128xf32>
    %58 = vector.broadcast %54 : f32 to vector<8x128xf32>
    %59 = arith.addf %57, %58 : vector<8x128xf32>
    %cst_15 = arith.constant 0.000000e+00 : f32
    %60 = vector.broadcast %cst_15 : f32 to vector<8x128xf32>
    %61 = arith.maximumf %59, %60 : vector<8x128xf32>
    %62 = vector.broadcast %55 : f32 to vector<8x128xf32>
    %63 = arith.mulf %61, %62 : vector<8x128xf32>
    %64 = arith.addf %52, %63 : vector<8x128xf32>
    %c5 = arith.constant 5 : index
    %65 = memref.load %arg2[%c5] : memref<32xf32, #tpu.memory_space<smem>>
    %c5_16 = arith.constant 5 : index
    %66 = memref.load %arg3[%c5_16] : memref<32xf32, #tpu.memory_space<smem>>
    %c5_17 = arith.constant 5 : index
    %67 = memref.load %arg4[%c5_17] : memref<32xf32, #tpu.memory_space<smem>>
    %68 = vector.broadcast %65 : f32 to vector<8x128xf32>
    %69 = arith.mulf %3, %68 : vector<8x128xf32>
    %70 = vector.broadcast %66 : f32 to vector<8x128xf32>
    %71 = arith.addf %69, %70 : vector<8x128xf32>
    %cst_18 = arith.constant 0.000000e+00 : f32
    %72 = vector.broadcast %cst_18 : f32 to vector<8x128xf32>
    %73 = arith.maximumf %71, %72 : vector<8x128xf32>
    %74 = vector.broadcast %67 : f32 to vector<8x128xf32>
    %75 = arith.mulf %73, %74 : vector<8x128xf32>
    %76 = arith.addf %64, %75 : vector<8x128xf32>
    %c6 = arith.constant 6 : index
    %77 = memref.load %arg2[%c6] : memref<32xf32, #tpu.memory_space<smem>>
    %c6_19 = arith.constant 6 : index
    %78 = memref.load %arg3[%c6_19] : memref<32xf32, #tpu.memory_space<smem>>
    %c6_20 = arith.constant 6 : index
    %79 = memref.load %arg4[%c6_20] : memref<32xf32, #tpu.memory_space<smem>>
    %80 = vector.broadcast %77 : f32 to vector<8x128xf32>
    %81 = arith.mulf %3, %80 : vector<8x128xf32>
    %82 = vector.broadcast %78 : f32 to vector<8x128xf32>
    %83 = arith.addf %81, %82 : vector<8x128xf32>
    %cst_21 = arith.constant 0.000000e+00 : f32
    %84 = vector.broadcast %cst_21 : f32 to vector<8x128xf32>
    %85 = arith.maximumf %83, %84 : vector<8x128xf32>
    %86 = vector.broadcast %79 : f32 to vector<8x128xf32>
    %87 = arith.mulf %85, %86 : vector<8x128xf32>
    %88 = arith.addf %76, %87 : vector<8x128xf32>
    %c7 = arith.constant 7 : index
    %89 = memref.load %arg2[%c7] : memref<32xf32, #tpu.memory_space<smem>>
    %c7_22 = arith.constant 7 : index
    %90 = memref.load %arg3[%c7_22] : memref<32xf32, #tpu.memory_space<smem>>
    %c7_23 = arith.constant 7 : index
    %91 = memref.load %arg4[%c7_23] : memref<32xf32, #tpu.memory_space<smem>>
    %92 = vector.broadcast %89 : f32 to vector<8x128xf32>
    %93 = arith.mulf %3, %92 : vector<8x128xf32>
    %94 = vector.broadcast %90 : f32 to vector<8x128xf32>
    %95 = arith.addf %93, %94 : vector<8x128xf32>
    %cst_24 = arith.constant 0.000000e+00 : f32
    %96 = vector.broadcast %cst_24 : f32 to vector<8x128xf32>
    %97 = arith.maximumf %95, %96 : vector<8x128xf32>
    %98 = vector.broadcast %91 : f32 to vector<8x128xf32>
    %99 = arith.mulf %97, %98 : vector<8x128xf32>
    %100 = arith.addf %88, %99 : vector<8x128xf32>
    %c8 = arith.constant 8 : index
    %101 = memref.load %arg2[%c8] : memref<32xf32, #tpu.memory_space<smem>>
    %c8_25 = arith.constant 8 : index
    %102 = memref.load %arg3[%c8_25] : memref<32xf32, #tpu.memory_space<smem>>
    %c8_26 = arith.constant 8 : index
    %103 = memref.load %arg4[%c8_26] : memref<32xf32, #tpu.memory_space<smem>>
    %104 = vector.broadcast %101 : f32 to vector<8x128xf32>
    %105 = arith.mulf %3, %104 : vector<8x128xf32>
    %106 = vector.broadcast %102 : f32 to vector<8x128xf32>
    %107 = arith.addf %105, %106 : vector<8x128xf32>
    %cst_27 = arith.constant 0.000000e+00 : f32
    %108 = vector.broadcast %cst_27 : f32 to vector<8x128xf32>
    %109 = arith.maximumf %107, %108 : vector<8x128xf32>
    %110 = vector.broadcast %103 : f32 to vector<8x128xf32>
    %111 = arith.mulf %109, %110 : vector<8x128xf32>
    %112 = arith.addf %100, %111 : vector<8x128xf32>
    %c9 = arith.constant 9 : index
    %113 = memref.load %arg2[%c9] : memref<32xf32, #tpu.memory_space<smem>>
    %c9_28 = arith.constant 9 : index
    %114 = memref.load %arg3[%c9_28] : memref<32xf32, #tpu.memory_space<smem>>
    %c9_29 = arith.constant 9 : index
    %115 = memref.load %arg4[%c9_29] : memref<32xf32, #tpu.memory_space<smem>>
    %116 = vector.broadcast %113 : f32 to vector<8x128xf32>
    %117 = arith.mulf %3, %116 : vector<8x128xf32>
    %118 = vector.broadcast %114 : f32 to vector<8x128xf32>
    %119 = arith.addf %117, %118 : vector<8x128xf32>
    %cst_30 = arith.constant 0.000000e+00 : f32
    %120 = vector.broadcast %cst_30 : f32 to vector<8x128xf32>
    %121 = arith.maximumf %119, %120 : vector<8x128xf32>
    %122 = vector.broadcast %115 : f32 to vector<8x128xf32>
    %123 = arith.mulf %121, %122 : vector<8x128xf32>
    %124 = arith.addf %112, %123 : vector<8x128xf32>
    %c10 = arith.constant 10 : index
    %125 = memref.load %arg2[%c10] : memref<32xf32, #tpu.memory_space<smem>>
    %c10_31 = arith.constant 10 : index
    %126 = memref.load %arg3[%c10_31] : memref<32xf32, #tpu.memory_space<smem>>
    %c10_32 = arith.constant 10 : index
    %127 = memref.load %arg4[%c10_32] : memref<32xf32, #tpu.memory_space<smem>>
    %128 = vector.broadcast %125 : f32 to vector<8x128xf32>
    %129 = arith.mulf %3, %128 : vector<8x128xf32>
    %130 = vector.broadcast %126 : f32 to vector<8x128xf32>
    %131 = arith.addf %129, %130 : vector<8x128xf32>
    %cst_33 = arith.constant 0.000000e+00 : f32
    %132 = vector.broadcast %cst_33 : f32 to vector<8x128xf32>
    %133 = arith.maximumf %131, %132 : vector<8x128xf32>
    %134 = vector.broadcast %127 : f32 to vector<8x128xf32>
    %135 = arith.mulf %133, %134 : vector<8x128xf32>
    %136 = arith.addf %124, %135 : vector<8x128xf32>
    %c11 = arith.constant 11 : index
    %137 = memref.load %arg2[%c11] : memref<32xf32, #tpu.memory_space<smem>>
    %c11_34 = arith.constant 11 : index
    %138 = memref.load %arg3[%c11_34] : memref<32xf32, #tpu.memory_space<smem>>
    %c11_35 = arith.constant 11 : index
    %139 = memref.load %arg4[%c11_35] : memref<32xf32, #tpu.memory_space<smem>>
    %140 = vector.broadcast %137 : f32 to vector<8x128xf32>
    %141 = arith.mulf %3, %140 : vector<8x128xf32>
    %142 = vector.broadcast %138 : f32 to vector<8x128xf32>
    %143 = arith.addf %141, %142 : vector<8x128xf32>
    %cst_36 = arith.constant 0.000000e+00 : f32
    %144 = vector.broadcast %cst_36 : f32 to vector<8x128xf32>
    %145 = arith.maximumf %143, %144 : vector<8x128xf32>
    %146 = vector.broadcast %139 : f32 to vector<8x128xf32>
    %147 = arith.mulf %145, %146 : vector<8x128xf32>
    %148 = arith.addf %136, %147 : vector<8x128xf32>
    %c12 = arith.constant 12 : index
    %149 = memref.load %arg2[%c12] : memref<32xf32, #tpu.memory_space<smem>>
    %c12_37 = arith.constant 12 : index
    %150 = memref.load %arg3[%c12_37] : memref<32xf32, #tpu.memory_space<smem>>
    %c12_38 = arith.constant 12 : index
    %151 = memref.load %arg4[%c12_38] : memref<32xf32, #tpu.memory_space<smem>>
    %152 = vector.broadcast %149 : f32 to vector<8x128xf32>
    %153 = arith.mulf %3, %152 : vector<8x128xf32>
    %154 = vector.broadcast %150 : f32 to vector<8x128xf32>
    %155 = arith.addf %153, %154 : vector<8x128xf32>
    %cst_39 = arith.constant 0.000000e+00 : f32
    %156 = vector.broadcast %cst_39 : f32 to vector<8x128xf32>
    %157 = arith.maximumf %155, %156 : vector<8x128xf32>
    %158 = vector.broadcast %151 : f32 to vector<8x128xf32>
    %159 = arith.mulf %157, %158 : vector<8x128xf32>
    %160 = arith.addf %148, %159 : vector<8x128xf32>
    %c13 = arith.constant 13 : index
    %161 = memref.load %arg2[%c13] : memref<32xf32, #tpu.memory_space<smem>>
    %c13_40 = arith.constant 13 : index
    %162 = memref.load %arg3[%c13_40] : memref<32xf32, #tpu.memory_space<smem>>
    %c13_41 = arith.constant 13 : index
    %163 = memref.load %arg4[%c13_41] : memref<32xf32, #tpu.memory_space<smem>>
    %164 = vector.broadcast %161 : f32 to vector<8x128xf32>
    %165 = arith.mulf %3, %164 : vector<8x128xf32>
    %166 = vector.broadcast %162 : f32 to vector<8x128xf32>
    %167 = arith.addf %165, %166 : vector<8x128xf32>
    %cst_42 = arith.constant 0.000000e+00 : f32
    %168 = vector.broadcast %cst_42 : f32 to vector<8x128xf32>
    %169 = arith.maximumf %167, %168 : vector<8x128xf32>
    %170 = vector.broadcast %163 : f32 to vector<8x128xf32>
    %171 = arith.mulf %169, %170 : vector<8x128xf32>
    %172 = arith.addf %160, %171 : vector<8x128xf32>
    %c14 = arith.constant 14 : index
    %173 = memref.load %arg2[%c14] : memref<32xf32, #tpu.memory_space<smem>>
    %c14_43 = arith.constant 14 : index
    %174 = memref.load %arg3[%c14_43] : memref<32xf32, #tpu.memory_space<smem>>
    %c14_44 = arith.constant 14 : index
    %175 = memref.load %arg4[%c14_44] : memref<32xf32, #tpu.memory_space<smem>>
    %176 = vector.broadcast %173 : f32 to vector<8x128xf32>
    %177 = arith.mulf %3, %176 : vector<8x128xf32>
    %178 = vector.broadcast %174 : f32 to vector<8x128xf32>
    %179 = arith.addf %177, %178 : vector<8x128xf32>
    %cst_45 = arith.constant 0.000000e+00 : f32
    %180 = vector.broadcast %cst_45 : f32 to vector<8x128xf32>
    %181 = arith.maximumf %179, %180 : vector<8x128xf32>
    %182 = vector.broadcast %175 : f32 to vector<8x128xf32>
    %183 = arith.mulf %181, %182 : vector<8x128xf32>
    %184 = arith.addf %172, %183 : vector<8x128xf32>
    %c15 = arith.constant 15 : index
    %185 = memref.load %arg2[%c15] : memref<32xf32, #tpu.memory_space<smem>>
    %c15_46 = arith.constant 15 : index
    %186 = memref.load %arg3[%c15_46] : memref<32xf32, #tpu.memory_space<smem>>
    %c15_47 = arith.constant 15 : index
    %187 = memref.load %arg4[%c15_47] : memref<32xf32, #tpu.memory_space<smem>>
    %188 = vector.broadcast %185 : f32 to vector<8x128xf32>
    %189 = arith.mulf %3, %188 : vector<8x128xf32>
    %190 = vector.broadcast %186 : f32 to vector<8x128xf32>
    %191 = arith.addf %189, %190 : vector<8x128xf32>
    %cst_48 = arith.constant 0.000000e+00 : f32
    %192 = vector.broadcast %cst_48 : f32 to vector<8x128xf32>
    %193 = arith.maximumf %191, %192 : vector<8x128xf32>
    %194 = vector.broadcast %187 : f32 to vector<8x128xf32>
    %195 = arith.mulf %193, %194 : vector<8x128xf32>
    %196 = arith.addf %184, %195 : vector<8x128xf32>
    %c16 = arith.constant 16 : index
    %197 = memref.load %arg2[%c16] : memref<32xf32, #tpu.memory_space<smem>>
    %c16_49 = arith.constant 16 : index
    %198 = memref.load %arg3[%c16_49] : memref<32xf32, #tpu.memory_space<smem>>
    %c16_50 = arith.constant 16 : index
    %199 = memref.load %arg4[%c16_50] : memref<32xf32, #tpu.memory_space<smem>>
    %200 = vector.broadcast %197 : f32 to vector<8x128xf32>
    %201 = arith.mulf %3, %200 : vector<8x128xf32>
    %202 = vector.broadcast %198 : f32 to vector<8x128xf32>
    %203 = arith.addf %201, %202 : vector<8x128xf32>
    %cst_51 = arith.constant 0.000000e+00 : f32
    %204 = vector.broadcast %cst_51 : f32 to vector<8x128xf32>
    %205 = arith.maximumf %203, %204 : vector<8x128xf32>
    %206 = vector.broadcast %199 : f32 to vector<8x128xf32>
    %207 = arith.mulf %205, %206 : vector<8x128xf32>
    %208 = arith.addf %196, %207 : vector<8x128xf32>
    %c17 = arith.constant 17 : index
    %209 = memref.load %arg2[%c17] : memref<32xf32, #tpu.memory_space<smem>>
    %c17_52 = arith.constant 17 : index
    %210 = memref.load %arg3[%c17_52] : memref<32xf32, #tpu.memory_space<smem>>
    %c17_53 = arith.constant 17 : index
    %211 = memref.load %arg4[%c17_53] : memref<32xf32, #tpu.memory_space<smem>>
    %212 = vector.broadcast %209 : f32 to vector<8x128xf32>
    %213 = arith.mulf %3, %212 : vector<8x128xf32>
    %214 = vector.broadcast %210 : f32 to vector<8x128xf32>
    %215 = arith.addf %213, %214 : vector<8x128xf32>
    %cst_54 = arith.constant 0.000000e+00 : f32
    %216 = vector.broadcast %cst_54 : f32 to vector<8x128xf32>
    %217 = arith.maximumf %215, %216 : vector<8x128xf32>
    %218 = vector.broadcast %211 : f32 to vector<8x128xf32>
    %219 = arith.mulf %217, %218 : vector<8x128xf32>
    %220 = arith.addf %208, %219 : vector<8x128xf32>
    %c18 = arith.constant 18 : index
    %221 = memref.load %arg2[%c18] : memref<32xf32, #tpu.memory_space<smem>>
    %c18_55 = arith.constant 18 : index
    %222 = memref.load %arg3[%c18_55] : memref<32xf32, #tpu.memory_space<smem>>
    %c18_56 = arith.constant 18 : index
    %223 = memref.load %arg4[%c18_56] : memref<32xf32, #tpu.memory_space<smem>>
    %224 = vector.broadcast %221 : f32 to vector<8x128xf32>
    %225 = arith.mulf %3, %224 : vector<8x128xf32>
    %226 = vector.broadcast %222 : f32 to vector<8x128xf32>
    %227 = arith.addf %225, %226 : vector<8x128xf32>
    %cst_57 = arith.constant 0.000000e+00 : f32
    %228 = vector.broadcast %cst_57 : f32 to vector<8x128xf32>
    %229 = arith.maximumf %227, %228 : vector<8x128xf32>
    %230 = vector.broadcast %223 : f32 to vector<8x128xf32>
    %231 = arith.mulf %229, %230 : vector<8x128xf32>
    %232 = arith.addf %220, %231 : vector<8x128xf32>
    %c19 = arith.constant 19 : index
    %233 = memref.load %arg2[%c19] : memref<32xf32, #tpu.memory_space<smem>>
    %c19_58 = arith.constant 19 : index
    %234 = memref.load %arg3[%c19_58] : memref<32xf32, #tpu.memory_space<smem>>
    %c19_59 = arith.constant 19 : index
    %235 = memref.load %arg4[%c19_59] : memref<32xf32, #tpu.memory_space<smem>>
    %236 = vector.broadcast %233 : f32 to vector<8x128xf32>
    %237 = arith.mulf %3, %236 : vector<8x128xf32>
    %238 = vector.broadcast %234 : f32 to vector<8x128xf32>
    %239 = arith.addf %237, %238 : vector<8x128xf32>
    %cst_60 = arith.constant 0.000000e+00 : f32
    %240 = vector.broadcast %cst_60 : f32 to vector<8x128xf32>
    %241 = arith.maximumf %239, %240 : vector<8x128xf32>
    %242 = vector.broadcast %235 : f32 to vector<8x128xf32>
    %243 = arith.mulf %241, %242 : vector<8x128xf32>
    %244 = arith.addf %232, %243 : vector<8x128xf32>
    %c20 = arith.constant 20 : index
    %245 = memref.load %arg2[%c20] : memref<32xf32, #tpu.memory_space<smem>>
    %c20_61 = arith.constant 20 : index
    %246 = memref.load %arg3[%c20_61] : memref<32xf32, #tpu.memory_space<smem>>
    %c20_62 = arith.constant 20 : index
    %247 = memref.load %arg4[%c20_62] : memref<32xf32, #tpu.memory_space<smem>>
    %248 = vector.broadcast %245 : f32 to vector<8x128xf32>
    %249 = arith.mulf %3, %248 : vector<8x128xf32>
    %250 = vector.broadcast %246 : f32 to vector<8x128xf32>
    %251 = arith.addf %249, %250 : vector<8x128xf32>
    %cst_63 = arith.constant 0.000000e+00 : f32
    %252 = vector.broadcast %cst_63 : f32 to vector<8x128xf32>
    %253 = arith.maximumf %251, %252 : vector<8x128xf32>
    %254 = vector.broadcast %247 : f32 to vector<8x128xf32>
    %255 = arith.mulf %253, %254 : vector<8x128xf32>
    %256 = arith.addf %244, %255 : vector<8x128xf32>
    %c21 = arith.constant 21 : index
    %257 = memref.load %arg2[%c21] : memref<32xf32, #tpu.memory_space<smem>>
    %c21_64 = arith.constant 21 : index
    %258 = memref.load %arg3[%c21_64] : memref<32xf32, #tpu.memory_space<smem>>
    %c21_65 = arith.constant 21 : index
    %259 = memref.load %arg4[%c21_65] : memref<32xf32, #tpu.memory_space<smem>>
    %260 = vector.broadcast %257 : f32 to vector<8x128xf32>
    %261 = arith.mulf %3, %260 : vector<8x128xf32>
    %262 = vector.broadcast %258 : f32 to vector<8x128xf32>
    %263 = arith.addf %261, %262 : vector<8x128xf32>
    %cst_66 = arith.constant 0.000000e+00 : f32
    %264 = vector.broadcast %cst_66 : f32 to vector<8x128xf32>
    %265 = arith.maximumf %263, %264 : vector<8x128xf32>
    %266 = vector.broadcast %259 : f32 to vector<8x128xf32>
    %267 = arith.mulf %265, %266 : vector<8x128xf32>
    %268 = arith.addf %256, %267 : vector<8x128xf32>
    %c22 = arith.constant 22 : index
    %269 = memref.load %arg2[%c22] : memref<32xf32, #tpu.memory_space<smem>>
    %c22_67 = arith.constant 22 : index
    %270 = memref.load %arg3[%c22_67] : memref<32xf32, #tpu.memory_space<smem>>
    %c22_68 = arith.constant 22 : index
    %271 = memref.load %arg4[%c22_68] : memref<32xf32, #tpu.memory_space<smem>>
    %272 = vector.broadcast %269 : f32 to vector<8x128xf32>
    %273 = arith.mulf %3, %272 : vector<8x128xf32>
    %274 = vector.broadcast %270 : f32 to vector<8x128xf32>
    %275 = arith.addf %273, %274 : vector<8x128xf32>
    %cst_69 = arith.constant 0.000000e+00 : f32
    %276 = vector.broadcast %cst_69 : f32 to vector<8x128xf32>
    %277 = arith.maximumf %275, %276 : vector<8x128xf32>
    %278 = vector.broadcast %271 : f32 to vector<8x128xf32>
    %279 = arith.mulf %277, %278 : vector<8x128xf32>
    %280 = arith.addf %268, %279 : vector<8x128xf32>
    %c23 = arith.constant 23 : index
    %281 = memref.load %arg2[%c23] : memref<32xf32, #tpu.memory_space<smem>>
    %c23_70 = arith.constant 23 : index
    %282 = memref.load %arg3[%c23_70] : memref<32xf32, #tpu.memory_space<smem>>
    %c23_71 = arith.constant 23 : index
    %283 = memref.load %arg4[%c23_71] : memref<32xf32, #tpu.memory_space<smem>>
    %284 = vector.broadcast %281 : f32 to vector<8x128xf32>
    %285 = arith.mulf %3, %284 : vector<8x128xf32>
    %286 = vector.broadcast %282 : f32 to vector<8x128xf32>
    %287 = arith.addf %285, %286 : vector<8x128xf32>
    %cst_72 = arith.constant 0.000000e+00 : f32
    %288 = vector.broadcast %cst_72 : f32 to vector<8x128xf32>
    %289 = arith.maximumf %287, %288 : vector<8x128xf32>
    %290 = vector.broadcast %283 : f32 to vector<8x128xf32>
    %291 = arith.mulf %289, %290 : vector<8x128xf32>
    %292 = arith.addf %280, %291 : vector<8x128xf32>
    %c24 = arith.constant 24 : index
    %293 = memref.load %arg2[%c24] : memref<32xf32, #tpu.memory_space<smem>>
    %c24_73 = arith.constant 24 : index
    %294 = memref.load %arg3[%c24_73] : memref<32xf32, #tpu.memory_space<smem>>
    %c24_74 = arith.constant 24 : index
    %295 = memref.load %arg4[%c24_74] : memref<32xf32, #tpu.memory_space<smem>>
    %296 = vector.broadcast %293 : f32 to vector<8x128xf32>
    %297 = arith.mulf %3, %296 : vector<8x128xf32>
    %298 = vector.broadcast %294 : f32 to vector<8x128xf32>
    %299 = arith.addf %297, %298 : vector<8x128xf32>
    %cst_75 = arith.constant 0.000000e+00 : f32
    %300 = vector.broadcast %cst_75 : f32 to vector<8x128xf32>
    %301 = arith.maximumf %299, %300 : vector<8x128xf32>
    %302 = vector.broadcast %295 : f32 to vector<8x128xf32>
    %303 = arith.mulf %301, %302 : vector<8x128xf32>
    %304 = arith.addf %292, %303 : vector<8x128xf32>
    %c25 = arith.constant 25 : index
    %305 = memref.load %arg2[%c25] : memref<32xf32, #tpu.memory_space<smem>>
    %c25_76 = arith.constant 25 : index
    %306 = memref.load %arg3[%c25_76] : memref<32xf32, #tpu.memory_space<smem>>
    %c25_77 = arith.constant 25 : index
    %307 = memref.load %arg4[%c25_77] : memref<32xf32, #tpu.memory_space<smem>>
    %308 = vector.broadcast %305 : f32 to vector<8x128xf32>
    %309 = arith.mulf %3, %308 : vector<8x128xf32>
    %310 = vector.broadcast %306 : f32 to vector<8x128xf32>
    %311 = arith.addf %309, %310 : vector<8x128xf32>
    %cst_78 = arith.constant 0.000000e+00 : f32
    %312 = vector.broadcast %cst_78 : f32 to vector<8x128xf32>
    %313 = arith.maximumf %311, %312 : vector<8x128xf32>
    %314 = vector.broadcast %307 : f32 to vector<8x128xf32>
    %315 = arith.mulf %313, %314 : vector<8x128xf32>
    %316 = arith.addf %304, %315 : vector<8x128xf32>
    %c26 = arith.constant 26 : index
    %317 = memref.load %arg2[%c26] : memref<32xf32, #tpu.memory_space<smem>>
    %c26_79 = arith.constant 26 : index
    %318 = memref.load %arg3[%c26_79] : memref<32xf32, #tpu.memory_space<smem>>
    %c26_80 = arith.constant 26 : index
    %319 = memref.load %arg4[%c26_80] : memref<32xf32, #tpu.memory_space<smem>>
    %320 = vector.broadcast %317 : f32 to vector<8x128xf32>
    %321 = arith.mulf %3, %320 : vector<8x128xf32>
    %322 = vector.broadcast %318 : f32 to vector<8x128xf32>
    %323 = arith.addf %321, %322 : vector<8x128xf32>
    %cst_81 = arith.constant 0.000000e+00 : f32
    %324 = vector.broadcast %cst_81 : f32 to vector<8x128xf32>
    %325 = arith.maximumf %323, %324 : vector<8x128xf32>
    %326 = vector.broadcast %319 : f32 to vector<8x128xf32>
    %327 = arith.mulf %325, %326 : vector<8x128xf32>
    %328 = arith.addf %316, %327 : vector<8x128xf32>
    %c27 = arith.constant 27 : index
    %329 = memref.load %arg2[%c27] : memref<32xf32, #tpu.memory_space<smem>>
    %c27_82 = arith.constant 27 : index
    %330 = memref.load %arg3[%c27_82] : memref<32xf32, #tpu.memory_space<smem>>
    %c27_83 = arith.constant 27 : index
    %331 = memref.load %arg4[%c27_83] : memref<32xf32, #tpu.memory_space<smem>>
    %332 = vector.broadcast %329 : f32 to vector<8x128xf32>
    %333 = arith.mulf %3, %332 : vector<8x128xf32>
    %334 = vector.broadcast %330 : f32 to vector<8x128xf32>
    %335 = arith.addf %333, %334 : vector<8x128xf32>
    %cst_84 = arith.constant 0.000000e+00 : f32
    %336 = vector.broadcast %cst_84 : f32 to vector<8x128xf32>
    %337 = arith.maximumf %335, %336 : vector<8x128xf32>
    %338 = vector.broadcast %331 : f32 to vector<8x128xf32>
    %339 = arith.mulf %337, %338 : vector<8x128xf32>
    %340 = arith.addf %328, %339 : vector<8x128xf32>
    %c28 = arith.constant 28 : index
    %341 = memref.load %arg2[%c28] : memref<32xf32, #tpu.memory_space<smem>>
    %c28_85 = arith.constant 28 : index
    %342 = memref.load %arg3[%c28_85] : memref<32xf32, #tpu.memory_space<smem>>
    %c28_86 = arith.constant 28 : index
    %343 = memref.load %arg4[%c28_86] : memref<32xf32, #tpu.memory_space<smem>>
    %344 = vector.broadcast %341 : f32 to vector<8x128xf32>
    %345 = arith.mulf %3, %344 : vector<8x128xf32>
    %346 = vector.broadcast %342 : f32 to vector<8x128xf32>
    %347 = arith.addf %345, %346 : vector<8x128xf32>
    %cst_87 = arith.constant 0.000000e+00 : f32
    %348 = vector.broadcast %cst_87 : f32 to vector<8x128xf32>
    %349 = arith.maximumf %347, %348 : vector<8x128xf32>
    %350 = vector.broadcast %343 : f32 to vector<8x128xf32>
    %351 = arith.mulf %349, %350 : vector<8x128xf32>
    %352 = arith.addf %340, %351 : vector<8x128xf32>
    %c29 = arith.constant 29 : index
    %353 = memref.load %arg2[%c29] : memref<32xf32, #tpu.memory_space<smem>>
    %c29_88 = arith.constant 29 : index
    %354 = memref.load %arg3[%c29_88] : memref<32xf32, #tpu.memory_space<smem>>
    %c29_89 = arith.constant 29 : index
    %355 = memref.load %arg4[%c29_89] : memref<32xf32, #tpu.memory_space<smem>>
    %356 = vector.broadcast %353 : f32 to vector<8x128xf32>
    %357 = arith.mulf %3, %356 : vector<8x128xf32>
    %358 = vector.broadcast %354 : f32 to vector<8x128xf32>
    %359 = arith.addf %357, %358 : vector<8x128xf32>
    %cst_90 = arith.constant 0.000000e+00 : f32
    %360 = vector.broadcast %cst_90 : f32 to vector<8x128xf32>
    %361 = arith.maximumf %359, %360 : vector<8x128xf32>
    %362 = vector.broadcast %355 : f32 to vector<8x128xf32>
    %363 = arith.mulf %361, %362 : vector<8x128xf32>
    %364 = arith.addf %352, %363 : vector<8x128xf32>
    %c30 = arith.constant 30 : index
    %365 = memref.load %arg2[%c30] : memref<32xf32, #tpu.memory_space<smem>>
    %c30_91 = arith.constant 30 : index
    %366 = memref.load %arg3[%c30_91] : memref<32xf32, #tpu.memory_space<smem>>
    %c30_92 = arith.constant 30 : index
    %367 = memref.load %arg4[%c30_92] : memref<32xf32, #tpu.memory_space<smem>>
    %368 = vector.broadcast %365 : f32 to vector<8x128xf32>
    %369 = arith.mulf %3, %368 : vector<8x128xf32>
    %370 = vector.broadcast %366 : f32 to vector<8x128xf32>
    %371 = arith.addf %369, %370 : vector<8x128xf32>
    %cst_93 = arith.constant 0.000000e+00 : f32
    %372 = vector.broadcast %cst_93 : f32 to vector<8x128xf32>
    %373 = arith.maximumf %371, %372 : vector<8x128xf32>
    %374 = vector.broadcast %367 : f32 to vector<8x128xf32>
    %375 = arith.mulf %373, %374 : vector<8x128xf32>
    %376 = arith.addf %364, %375 : vector<8x128xf32>
    %c31 = arith.constant 31 : index
    %377 = memref.load %arg2[%c31] : memref<32xf32, #tpu.memory_space<smem>>
    %c31_94 = arith.constant 31 : index
    %378 = memref.load %arg3[%c31_94] : memref<32xf32, #tpu.memory_space<smem>>
    %c31_95 = arith.constant 31 : index
    %379 = memref.load %arg4[%c31_95] : memref<32xf32, #tpu.memory_space<smem>>
    %380 = vector.broadcast %377 : f32 to vector<8x128xf32>
    %381 = arith.mulf %3, %380 : vector<8x128xf32>
    %382 = vector.broadcast %378 : f32 to vector<8x128xf32>
    %383 = arith.addf %381, %382 : vector<8x128xf32>
    %cst_96 = arith.constant 0.000000e+00 : f32
    %384 = vector.broadcast %cst_96 : f32 to vector<8x128xf32>
    %385 = arith.maximumf %383, %384 : vector<8x128xf32>
    %386 = vector.broadcast %379 : f32 to vector<8x128xf32>
    %387 = arith.mulf %385, %386 : vector<8x128xf32>
    %388 = arith.addf %376, %387 : vector<8x128xf32>
    %389 = math.exp %388 : vector<8x128xf32>
    %cst_97 = arith.constant 1.000000e+00 : f32
    %390 = vector.broadcast %cst_97 : f32 to vector<8x128xf32>
    %391 = arith.addf %390, %389 : vector<8x128xf32>
    %392 = tpu.reciprocal %391 {approx = true} : vector<8x128xf32> -> vector<8x128xf32>
    %393 = arith.index_cast %1 : i32 to index
    %c0_98 = arith.constant 0 : index
    %394 = vector.load %arg6[%393, %c0_98] : memref<8x128xf32, #tpu.memory_space<vmem>>, vector<8x128xf32>
    tpu.vector_store %arg6[%393, %c0_98], %392 {strides = array<i32>} : memref<8x128xf32, #tpu.memory_space<vmem>>, vector<8x128xf32>,
    return
  }
  func.func @transform_0(%arg0: i32) -> (i32, i32) {
    %c0_i32 = arith.constant 0 : i32
    %c0_i32_0 = arith.constant 0 : i32
    return %arg0, %c0_i32 : i32, i32
  }
  func.func @transform_1(%arg0: i32) -> i32 {
    %c0_i32 = arith.constant 0 : i32
    %c0_i32_0 = arith.constant 0 : i32
    return %c0_i32 : i32
  }
  func.func @transform_2(%arg0: i32) -> i32 {
    %c0_i32 = arith.constant 0 : i32
    %c0_i32_0 = arith.constant 0 : i32
    return %c0_i32 : i32
  }
  func.func @transform_3(%arg0: i32) -> i32 {
    %c0_i32 = arith.constant 0 : i32
    %c0_i32_0 = arith.constant 0 : i32
    return %c0_i32 : i32
  }
  func.func @transform_4(%arg0: i32) -> i32 {
    %c0_i32 = arith.constant 0 : i32
    %c0_i32_0 = arith.constant 0 : i32
    return %c0_i32 : i32
  }
  func.func @transform_5(%arg0: i32) -> (i32, i32) {
    %c0_i32 = arith.constant 0 : i32
    %c0_i32_0 = arith.constant 0 : i32
    return %arg0, %c0_i32 : i32, i32
  }
}

</mosaic_0001>

<bundles_post_ra>
// kernel: tpu_custom_call.1
= control target key start
LH: loop header
LB: loop body
LE: loop exit
PB: predicated region body
PF: predicated region fallthrough
CT: control target
= control target key end

     0   :  { %11 = vsyncpa [#allocation4], 0  ;;  %s807_s0 = inlined_call_operand.hbm [shape: f32[8,128], index: 0, kind: input, shape index: {}]   ;;  %s808_s1 = inlined_call_operand.vmem [shape: f32[32], index: 1, kind: input, shape index: {}]   ;;  %s809_s2 = inlined_call_operand.vmem [shape: f32[32], index: 2, kind: input, shape index: {}]   ;;  %s810_s3 = inlined_call_operand.vmem [shape: f32[32], index: 3, kind: input, shape index: {}]   ;;  %s811_s4 = inlined_call_operand.<no memory space> [shape: f32[1], index: 4, kind: input, shape index: {}]   ;;  %s812_s5 = inlined_call_operand.hbm [shape: f32[8,128], index: 5, kind: output, shape index: {}]  }
   0x1   :  { %12 = vsyncpa [#allocation6], 0 }
   0x2   :  { %13 = vsyncpa [#allocation9], 0  ;;  %s41_s20 = sshll.u32 %s809_s2, 4  ;;  %s42_s20 = int_to_ptr.vmem [resolvable:$true] %s41_s20 }
   0x3   :  { %14 = vsyncpa [#allocation5], 0  ;;  %s549_s21 = scalar_lea.vmem %s42_s20, 16  ;;  %p554_p1 = scmp.lt.s32.totalorder %s42_s20, %s42_s20 }
   0x4   :  { %p550_p0 = scmp.ne.s32.totalorder %s42_s20, %s549_s21  ;;  %p555_p2 = scmp.lt.s32.totalorder %s549_s21, %s549_s21 }
   0x6   :  { %p556_p3 = por %p555_p2, %p554_p1 }
   0x8   :  { %p557_p4 = pnand %p556_p3, %p550_p0 }
   0xa   :  { %560 = shalt.err (!%p557_p4)
}
   0xb   :  { %s633_s22 = smov [#allocation8]   ;;  %s634_s23 = smov [#allocation3]  }
   0xc   :  { %44 = dma.vmem_to_smem %s42_s20, 16, %s633_s22, [#allocation9]  }
   0xd   :  { %s21_s24 = sshll.u32 %s634_s23, 4  ;;  %s31_s27 = sshll.u32 %s808_s1, 4  ;;  %s22_s24 = int_to_ptr.vmem [resolvable:$true] %s21_s24  ;;  %s32_s27 = int_to_ptr.vmem [resolvable:$true] %s31_s27 }
   0xe   :  { %s569_s2 = scalar_lea.vmem %s22_s24, 128  ;;  %p574_p6 = scmp.lt.s32.totalorder %s22_s24, %s22_s24 }
   0xf   :  { %p570_p5 = scmp.ne.s32.totalorder %s22_s24, %s569_s2  ;;  %p575_p7 = scmp.lt.s32.totalorder %s569_s2, %s569_s2 }
  0x11   :  { %p576_p8 = por %p575_p7, %p574_p6 }
  0x13   :  { %p577_p9 = pnand %p576_p8, %p570_p5 }
  0x15   :  { %580 = shalt.err (!%p577_p9)
}
  0x16   :  { %24 = dma.hbm_to_vmem [thread:$0]  %s807_s0, 128, %s22_s24, [#allocation4]  }
  0x17   :  { %s51_s7 = sshll.u32 %s810_s3, 4  ;;  %s581_s8 = scalar_lea.vmem %s32_s27, 16  ;;  %s52_s7 = int_to_ptr.vmem [resolvable:$true] %s51_s7 }
  0x18   :  { %p582_p10 = scmp.ne.s32.totalorder %s32_s27, %s581_s8  ;;  %p586_p11 = scmp.lt.s32.totalorder %s32_s27, %s32_s27 }
  0x19   :  { %p587_p12 = scmp.lt.s32.totalorder %s581_s8, %s581_s8 }
  0x1b   :  { %p588_p13 = por %p587_p12, %p586_p11 }
  0x1d   :  { %p589_p0 = pnand %p588_p13, %p582_p10 }
  0x1f   :  { %592 = shalt.err (!%p589_p0)
}
  0x20   :  { %s635_s1 = smov [#allocation7]   ;;  %s593_s9 = scalar_lea.vmem %s52_s7, 16 }
  0x21   :  { %34 = dma.vmem_to_smem %s32_s27, 16, %s635_s1, [#allocation6]  }
  0x22   :  { %p594_p1 = scmp.ne.s32.totalorder %s52_s7, %s593_s9  ;;  %p598_p2 = scmp.lt.s32.totalorder %s52_s7, %s52_s7 }
  0x23   :  { %p599_p3 = scmp.lt.s32.totalorder %s593_s9, %s593_s9 }
  0x25   :  { %p600_p4 = por %p599_p3, %p598_p2 }
  0x27   :  { %p601_p5 = pnand %p600_p4, %p594_p1 }
  0x29   :  { %604 = shalt.err (!%p601_p5)
}
  0x2a   :  { %s636_s0 = smov [#allocation10]  }
  0x2b   :  { %54 = dma.vmem_to_smem %s52_s7, 16, %s636_s0, [#allocation9]  }
  0x2c   :  { %625 = dma.done.wait [#allocation4], 128  }
  0x2d   :  { %626 = vsyncadd [#allocation4], 4294967168 }
  0x2e   :  { %627 = dma.done.wait [#allocation6], 16  }
  0x2f   :  { %628 = vsyncadd [#allocation6], 4294967280 }
  0x30   :  { %629 = dma.done.wait [#allocation9], 32  }
  0x31   :  { %630 = vsyncadd [#allocation9], 4294967264 }
  0x32   :  { %69 = sfence }
  0x33   :  { %s73_s3 = sld [smem:[#allocation7]]  ;;  %v680_v0 = vld [vmem:[#allocation3] sm:$0xff]  ;;  %v72_v10 = vstv %s811_s4 }
  0x34   :  { %s74_s10 = sld [smem:[#allocation8]] }
  0x35   :  { %s75_s11 = sld [smem:[#allocation10]] }
  0x36   :  { %s447_s12 = sld [smem:[#allocation7 + $0x1]] }
  0x37   :  { %s448_s13 = sld [smem:[#allocation8 + $0x1]] }
  0x38   :  { %s682_s14 = sld [smem:[#allocation10 + $0x1]] }
  0x39   :  { %v76_v1 = vstv %s73_s3  ;;  %s450_s15 = sld [smem:[#allocation7 + $0x2]] }
  0x3a   :  { %v77_v2 = vmul.f32 %v76_v1, %v680_v0  ;;  %v78_v3 = vstv %s74_s10  ;;  %s451_s16 = sld [smem:[#allocation8 + $0x2]] }
  0x3b   :  { %s685_s17 = sld [smem:[#allocation10 + $0x2]]  ;;  %v81_v6 = vstv %s75_s11 }
  0x3c   :  { %v79_v4 = vadd.f32 %v78_v3, %v77_v2  ;;  %v87_v5 = vstv %s447_s12  ;;  %s453_s18 = sld [smem:[#allocation7 + $0x3]] }
  0x3d   :  { %v88_v7 = vmul.f32 %v87_v5, %v680_v0  ;;  %v89_v8 = vstv %s448_s13  ;;  %s454_s19 = sld [smem:[#allocation8 + $0x3]] }
  0x3e   :  { %v80_v9 = vmax.f32 %v79_v4, 0.0  ;;  %s688_s20 = sld [smem:[#allocation10 + $0x3]]  ;;  %v92_v14 = vstv %s682_s14 }
  0x3f   :  { %v90_v11 = vadd.f32 %v89_v8, %v88_v7  ;;  %v98_v12 = vstv %s450_s15  ;;  %s456_s23 = sld [smem:[#allocation7 + $0x4]] }
  0x40   :  { %v82_v13 = vmul.f32 %v81_v6, %v80_v9  ;;  %v99_v15 = vmul.f32 %v98_v12, %v680_v0  ;;  %v100_v16 = vstv %s451_s16  ;;  %s457_s24 = sld [smem:[#allocation8 + $0x4]] }
  0x41   :  { %v91_v17 = vmax.f32 %v90_v11, 0.0  ;;  %s695_s25 = sld [smem:[#allocation10 + $0x4]]  ;;  %v103_v22 = vstv %s685_s17 }
  0x42   :  { %v83_v18 = vadd.f32 %v82_v13, %v72_v10  ;;  %v101_v19 = vadd.f32 %v100_v16, %v99_v15  ;;  %v109_v20 = vstv %s453_s18  ;;  %s459_s26 = sld [smem:[#allocation7 + $0x5]] }
  0x43   :  { %v93_v21 = vmul.f32 %v92_v14, %v91_v17  ;;  %v110_v23 = vmul.f32 %v109_v20, %v680_v0  ;;  %v111_v24 = vstv %s454_s19  ;;  %s460_s4 = sld [smem:[#allocation8 + $0x5]] }
  0x44   :  { %v102_v25 = vmax.f32 %v101_v19, 0.0  ;;  %s699_s27 = sld [smem:[#allocation10 + $0x5]]  ;;  %v114_v30 = vstv %s688_s20 }
  0x45   :  { %v94_v26 = vadd.f32 %v93_v21, %v83_v18  ;;  %v112_v27 = vadd.f32 %v111_v24, %v110_v23  ;;  %v120_v28 = vstv %s456_s23  ;;  %s462_s2 = sld [smem:[#allocation7 + $0x6]] }
  0x46   :  { %v104_v29 = vmul.f32 %v103_v22, %v102_v25  ;;  %v121_v31 = vmul.f32 %v120_v28, %v680_v0  ;;  %v122_v32 = vstv %s457_s24  ;;  %s463_s28 = sld [smem:[#allocation8 + $0x6]] }
  0x47   :  { %v113_v33 = vmax.f32 %v112_v27, 0.0  ;;  %s703_s29 = sld [smem:[#allocation10 + $0x6]]  ;;  %v125_v38 = vstv %s695_s25 }
  0x48   :  { %v105_v34 = vadd.f32 %v104_v29, %v94_v26  ;;  %v123_v35 = vadd.f32 %v122_v32, %v121_v31  ;;  %v131_v36 = vstv %s459_s26  ;;  %s465_s30 = sld [smem:[#allocation7 + $0x7]] }
  0x49   :  { %v115_v37 = vmul.f32 %v114_v30, %v113_v33  ;;  %v132_v39 = vmul.f32 %v131_v36, %v680_v0  ;;  %v133_v40 = vstv %s460_s4  ;;  %s466_s6 = sld [smem:[#allocation8 + $0x7]] }
  0x4a   :  { %v124_v41 = vmax.f32 %v123_v35, 0.0  ;;  %s707_s7 = sld [smem:[#allocation10 + $0x7]]  ;;  %v136_v46 = vstv %s699_s27 }
  0x4b   :  { %v116_v42 = vadd.f32 %v115_v37, %v105_v34  ;;  %v134_v43 = vadd.f32 %v133_v40, %v132_v39  ;;  %v142_v44 = vstv %s462_s2  ;;  %s468_s8 = sld [smem:[#allocation7 + $0x8]] }
  0x4c   :  { %v126_v45 = vmul.f32 %v125_v38, %v124_v41  ;;  %v143_v47 = vmul.f32 %v142_v44, %v680_v0  ;;  %v144_v48 = vstv %s463_s28  ;;  %s469_s1 = sld [smem:[#allocation8 + $0x8]] }
  0x4d   :  { %v135_v49 = vmax.f32 %v134_v43, 0.0  ;;  %s711_s9 = sld [smem:[#allocation10 + $0x8]]  ;;  %v147_v54 = vstv %s703_s29 }
  0x4e   :  { %v127_v50 = vadd.f32 %v126_v45, %v116_v42  ;;  %v145_v51 = vadd.f32 %v144_v48, %v143_v47  ;;  %v153_v52 = vstv %s465_s30  ;;  %s471_s0 = sld [smem:[#allocation7 + $0x9]] }
  0x4f   :  { %v137_v53 = vmul.f32 %v136_v46, %v135_v49  ;;  %v154_v55 = vmul.f32 %v153_v52, %v680_v0  ;;  %v155_v56 = vstv %s466_s6  ;;  %s472_s3 = sld [smem:[#allocation8 + $0x9]] }
  0x50   :  { %v146_v57 = vmax.f32 %v145_v51, 0.0  ;;  %s715_s10 = sld [smem:[#allocation10 + $0x9]]  ;;  %v158_v62 = vstv %s707_s7 }
  0x51   :  { %v138_v58 = vadd.f32 %v137_v53, %v127_v50  ;;  %v156_v59 = vadd.f32 %v155_v56, %v154_v55  ;;  %v164_v60 = vstv %s468_s8  ;;  %s474_s11 = sld [smem:[#allocation7 + $0xa]] }
  0x52   :  { %v148_v61 = vmul.f32 %v147_v54, %v146_v57  ;;  %v165_v63 = vmul.f32 %v164_v60, %v680_v0  ;;  %v166_v1 = vstv %s469_s1  ;;  %s475_s12 = sld [smem:[#allocation8 + $0xa]] }
  0x53   :  { %v157_v2 = vmax.f32 %v156_v59, 0.0  ;;  %s719_s13 = sld [smem:[#allocation10 + $0xa]]  ;;  %v169_v7 = vstv %s711_s9 }
  0x54   :  { %v149_v3 = vadd.f32 %v148_v61, %v138_v58  ;;  %v167_v4 = vadd.f32 %v166_v1, %v165_v63  ;;  %v175_v5 = vstv %s471_s0  ;;  %s477_s14 = sld [smem:[#allocation7 + $0xb]] }
  0x55   :  { %v159_v6 = vmul.f32 %v158_v62, %v157_v2  ;;  %v176_v8 = vmul.f32 %v175_v5, %v680_v0  ;;  %v177_v9 = vstv %s472_s3  ;;  %s478_s15 = sld [smem:[#allocation8 + $0xb]] }
  0x56   :  { %v168_v10 = vmax.f32 %v167_v4, 0.0  ;;  %s723_s16 = sld [smem:[#allocation10 + $0xb]]  ;;  %v180_v15 = vstv %s715_s10 }
  0x57   :  { %v160_v11 = vadd.f32 %v159_v6, %v149_v3  ;;  %v178_v12 = vadd.f32 %v177_v9, %v176_v8  ;;  %v186_v13 = vstv %s474_s11  ;;  %s480_s17 = sld [smem:[#allocation7 + $0xc]] }
  0x58   :  { %v170_v14 = vmul.f32 %v169_v7, %v168_v10  ;;  %v187_v16 = vmul.f32 %v186_v13, %v680_v0  ;;  %v188_v17 = vstv %s475_s12  ;;  %s481_s18 = sld [smem:[#allocation8 + $0xc]] }
  0x59   :  { %v179_v18 = vmax.f32 %v178_v12, 0.0  ;;  %s727_s19 = sld [smem:[#allocation10 + $0xc]]  ;;  %v191_v23 = vstv %s719_s13 }
  0x5a   :  { %v171_v19 = vadd.f32 %v170_v14, %v160_v11  ;;  %v189_v20 = vadd.f32 %v188_v17, %v187_v16  ;;  %v197_v21 = vstv %s477_s14  ;;  %s483_s20 = sld [smem:[#allocation7 + $0xd]] }
  0x5b   :  { %v181_v22 = vmul.f32 %v180_v15, %v179_v18  ;;  %v198_v24 = vmul.f32 %v197_v21, %v680_v0  ;;  %v199_v25 = vstv %s478_s15  ;;  %s484_s21 = sld [smem:[#allocation8 + $0xd]] }
  0x5c   :  { %v190_v26 = vmax.f32 %v189_v20, 0.0  ;;  %s731_s22 = sld [smem:[#allocation10 + $0xd]]  ;;  %v202_v31 = vstv %s723_s16 }
  0x5d   :  { %v182_v27 = vadd.f32 %v181_v22, %v171_v19  ;;  %v200_v28 = vadd.f32 %v199_v25, %v198_v24  ;;  %v208_v29 = vstv %s480_s17  ;;  %s486_s23 = sld [smem:[#allocation7 + $0xe]] }
  0x5e   :  { %v192_v30 = vmul.f32 %v191_v23, %v190_v26  ;;  %v209_v32 = vmul.f32 %v208_v29, %v680_v0  ;;  %v210_v33 = vstv %s481_s18  ;;  %s487_s24 = sld [smem:[#allocation8 + $0xe]] }
  0x5f   :  { %v201_v34 = vmax.f32 %v200_v28, 0.0  ;;  %s735_s25 = sld [smem:[#allocation10 + $0xe]]  ;;  %v213_v39 = vstv %s727_s19 }
  0x60   :  { %v193_v35 = vadd.f32 %v192_v30, %v182_v27  ;;  %v211_v36 = vadd.f32 %v210_v33, %v209_v32  ;;  %v219_v37 = vstv %s483_s20  ;;  %s489_s26 = sld [smem:[#allocation7 + $0xf]] }
  0x61   :  { %v203_v38 = vmul.f32 %v202_v31, %v201_v34  ;;  %v220_v40 = vmul.f32 %v219_v37, %v680_v0  ;;  %v221_v41 = vstv %s484_s21  ;;  %s490_s4 = sld [smem:[#allocation8 + $0xf]] }
  0x62   :  { %v212_v42 = vmax.f32 %v211_v36, 0.0  ;;  %s739_s27 = sld [smem:[#allocation10 + $0xf]]  ;;  %v224_v47 = vstv %s731_s22 }
  0x63   :  { %v204_v43 = vadd.f32 %v203_v38, %v193_v35  ;;  %v222_v44 = vadd.f32 %v221_v41, %v220_v40  ;;  %v230_v45 = vstv %s486_s23  ;;  %s492_s2 = sld [smem:[#allocation7 + $0x10]] }
  0x64   :  { %v214_v46 = vmul.f32 %v213_v39, %v212_v42  ;;  %v231_v48 = vmul.f32 %v230_v45, %v680_v0  ;;  %v232_v49 = vstv %s487_s24  ;;  %s493_s28 = sld [smem:[#allocation8 + $0x10]] }
  0x65   :  { %v223_v50 = vmax.f32 %v222_v44, 0.0  ;;  %s743_s29 = sld [smem:[#allocation10 + $0x10]]  ;;  %v235_v55 = vstv %s735_s25 }
  0x66   :  { %v215_v51 = vadd.f32 %v214_v46, %v204_v43  ;;  %v233_v52 = vadd.f32 %v232_v49, %v231_v48  ;;  %v241_v53 = vstv %s489_s26  ;;  %s495_s30 = sld [smem:[#allocation7 + $0x11]] }
  0x67   :  { %v225_v54 = vmul.f32 %v224_v47, %v223_v50  ;;  %v242_v56 = vmul.f32 %v241_v53, %v680_v0  ;;  %v243_v57 = vstv %s490_s4  ;;  %s496_s6 = sld [smem:[#allocation8 + $0x11]] }
  0x68   :  { %v234_v58 = vmax.f32 %v233_v52, 0.0  ;;  %s747_s7 = sld [smem:[#allocation10 + $0x11]]  ;;  %v246_v63 = vstv %s739_s27 }
  0x69   :  { %v226_v59 = vadd.f32 %v225_v54, %v215_v51  ;;  %v244_v60 = vadd.f32 %v243_v57, %v242_v56  ;;  %v252_v61 = vstv %s492_s2  ;;  %s498_s8 = sld [smem:[#allocation7 + $0x12]] }
  0x6a   :  { %v236_v62 = vmul.f32 %v235_v55, %v234_v58  ;;  %v253_v1 = vmul.f32 %v252_v61, %v680_v0  ;;  %v254_v2 = vstv %s493_s28  ;;  %s499_s1 = sld [smem:[#allocation8 + $0x12]] }
  0x6b   :  { %v245_v3 = vmax.f32 %v244_v60, 0.0  ;;  %s751_s9 = sld [smem:[#allocation10 + $0x12]]  ;;  %v257_v8 = vstv %s743_s29 }
  0x6c   :  { %v237_v4 = vadd.f32 %v236_v62, %v226_v59  ;;  %v255_v5 = vadd.f32 %v254_v2, %v253_v1  ;;  %v263_v6 = vstv %s495_s30  ;;  %s501_s0 = sld [smem:[#allocation7 + $0x13]] }
  0x6d   :  { %v247_v7 = vmul.f32 %v246_v63, %v245_v3  ;;  %v264_v9 = vmul.f32 %v263_v6, %v680_v0  ;;  %v265_v10 = vstv %s496_s6  ;;  %s502_s3 = sld [smem:[#allocation8 + $0x13]] }
  0x6e   :  { %v256_v11 = vmax.f32 %v255_v5, 0.0  ;;  %s755_s10 = sld [smem:[#allocation10 + $0x13]]  ;;  %v268_v16 = vstv %s747_s7 }
  0x6f   :  { %v248_v12 = vadd.f32 %v247_v7, %v237_v4  ;;  %v266_v13 = vadd.f32 %v265_v10, %v264_v9  ;;  %v274_v14 = vstv %s498_s8  ;;  %s504_s11 = sld [smem:[#allocation7 + $0x14]] }
  0x70   :  { %v258_v15 = vmul.f32 %v257_v8, %v256_v11  ;;  %v275_v17 = vmul.f32 %v274_v14, %v680_v0  ;;  %v276_v18 = vstv %s499_s1  ;;  %s505_s12 = sld [smem:[#allocation8 + $0x14]] }
  0x71   :  { %v267_v19 = vmax.f32 %v266_v13, 0.0  ;;  %s759_s13 = sld [smem:[#allocation10 + $0x14]]  ;;  %v279_v24 = vstv %s751_s9 }
  0x72   :  { %v259_v20 = vadd.f32 %v258_v15, %v248_v12  ;;  %v277_v21 = vadd.f32 %v276_v18, %v275_v17  ;;  %v285_v22 = vstv %s501_s0  ;;  %s507_s14 = sld [smem:[#allocation7 + $0x15]] }
  0x73   :  { %v269_v23 = vmul.f32 %v268_v16, %v267_v19  ;;  %v286_v25 = vmul.f32 %v285_v22, %v680_v0  ;;  %v287_v26 = vstv %s502_s3  ;;  %s508_s15 = sld [smem:[#allocation8 + $0x15]] }
  0x74   :  { %v278_v27 = vmax.f32 %v277_v21, 0.0  ;;  %s763_s16 = sld [smem:[#allocation10 + $0x15]]  ;;  %v290_v32 = vstv %s755_s10 }
  0x75   :  { %v270_v28 = vadd.f32 %v269_v23, %v259_v20  ;;  %v288_v29 = vadd.f32 %v287_v26, %v286_v25  ;;  %v296_v30 = vstv %s504_s11  ;;  %s510_s17 = sld [smem:[#allocation7 + $0x16]] }
  0x76   :  { %v280_v31 = vmul.f32 %v279_v24, %v278_v27  ;;  %v297_v33 = vmul.f32 %v296_v30, %v680_v0  ;;  %v298_v34 = vstv %s505_s12  ;;  %s511_s18 = sld [smem:[#allocation8 + $0x16]] }
  0x77   :  { %v289_v35 = vmax.f32 %v288_v29, 0.0  ;;  %s767_s19 = sld [smem:[#allocation10 + $0x16]]  ;;  %v301_v40 = vstv %s759_s13 }
  0x78   :  { %v281_v36 = vadd.f32 %v280_v31, %v270_v28  ;;  %v299_v37 = vadd.f32 %v298_v34, %v297_v33  ;;  %v307_v38 = vstv %s507_s14  ;;  %s513_s20 = sld [smem:[#allocation7 + $0x17]] }
  0x79   :  { %v291_v39 = vmul.f32 %v290_v32, %v289_v35  ;;  %v308_v41 = vmul.f32 %v307_v38, %v680_v0  ;;  %v309_v42 = vstv %s508_s15  ;;  %s514_s21 = sld [smem:[#allocation8 + $0x17]] }
  0x7a   :  { %v300_v43 = vmax.f32 %v299_v37, 0.0  ;;  %s771_s22 = sld [smem:[#allocation10 + $0x17]]  ;;  %v312_v48 = vstv %s763_s16 }
  0x7b   :  { %v292_v44 = vadd.f32 %v291_v39, %v281_v36  ;;  %v310_v45 = vadd.f32 %v309_v42, %v308_v41  ;;  %v318_v46 = vstv %s510_s17  ;;  %s516_s23 = sld [smem:[#allocation7 + $0x18]]  ;;  %s637_s17 = smov [#allocation11]  }
  0x7c   :  { %v302_v47 = vmul.f32 %v301_v40, %v300_v43  ;;  %v319_v49 = vmul.f32 %v318_v46, %v680_v0  ;;  %v320_v50 = vstv %s511_s18  ;;  %s517_s24 = sld [smem:[#allocation8 + $0x18]]  ;;  %s436_s18 = sshll.u32 %s637_s17, 4  ;;  %s437_s18 = int_to_ptr.vmem [resolvable:$true] %s436_s18 }
  0x7d   :  { %v311_v51 = vmax.f32 %v310_v45, 0.0  ;;  %s775_s25 = sld [smem:[#allocation10 + $0x18]]  ;;  %v323_v56 = vstv %s767_s19  ;;  %s605_s19 = scalar_lea.vmem %s437_s18, 128 }
  0x7e   :  { %v303_v52 = vadd.f32 %v302_v47, %v292_v44  ;;  %v321_v53 = vadd.f32 %v320_v50, %v319_v49  ;;  %v329_v54 = vstv %s513_s20  ;;  %s519_s26 = sld [smem:[#allocation7 + $0x19]]  ;;  %p606_p6 = scmp.ne.s32.totalorder %s437_s18, %s605_s19 }
  0x7f   :  { %v313_v55 = vmul.f32 %v312_v48, %v311_v51  ;;  %v330_v57 = vmul.f32 %v329_v54, %v680_v0  ;;  %v331_v58 = vstv %s514_s21  ;;  %s520_s4 = sld [smem:[#allocation8 + $0x19]]  ;;  %p610_p7 = scmp.lt.s32.totalorder %s437_s18, %s437_s18 }
  0x80   :  { %v322_v59 = vmax.f32 %v321_v53, 0.0  ;;  %s779_s27 = sld [smem:[#allocation10 + $0x19]]  ;;  %v334_v1 = vstv %s771_s22  ;;  %p611_p8 = scmp.lt.s32.totalorder %s605_s19, %s605_s19 }
  0x81   :  { %v314_v60 = vadd.f32 %v313_v55, %v303_v52  ;;  %v332_v61 = vadd.f32 %v331_v58, %v330_v57  ;;  %v340_v62 = vstv %s516_s23  ;;  %s522_s2 = sld [smem:[#allocation7 + $0x1a]] }
  0x82   :  { %v324_v63 = vmul.f32 %v323_v56, %v322_v59  ;;  %v341_v2 = vmul.f32 %v340_v62, %v680_v0  ;;  %v342_v3 = vstv %s517_s24  ;;  %s523_s28 = sld [smem:[#allocation8 + $0x1a]]  ;;  %p612_p9 = por %p611_p8, %p610_p7 }
  0x83   :  { %v333_v4 = vmax.f32 %v332_v61, 0.0  ;;  %s783_s29 = sld [smem:[#allocation10 + $0x1a]]  ;;  %v345_v9 = vstv %s775_s25 }
  0x84   :  { %v325_v5 = vadd.f32 %v324_v63, %v314_v60  ;;  %v343_v6 = vadd.f32 %v342_v3, %v341_v2  ;;  %v351_v7 = vstv %s519_s26  ;;  %s525_s30 = sld [smem:[#allocation7 + $0x1b]]  ;;  %p613_p10 = pnand %p612_p9, %p606_p6 }
  0x85   :  { %v335_v8 = vmul.f32 %v334_v1, %v333_v4  ;;  %v352_v10 = vmul.f32 %v351_v7, %v680_v0  ;;  %v353_v11 = vstv %s520_s4  ;;  %s526_s6 = sld [smem:[#allocation8 + $0x1b]] }
  0x86   :  { %v344_v12 = vmax.f32 %v343_v6, 0.0  ;;  %s787_s7 = sld [smem:[#allocation10 + $0x1b]]  ;;  %v356_v17 = vstv %s779_s27 }
  0x87   :  { %v336_v13 = vadd.f32 %v335_v8, %v325_v5  ;;  %v354_v14 = vadd.f32 %v353_v11, %v352_v10  ;;  %v362_v15 = vstv %s522_s2  ;;  %s528_s8 = sld [smem:[#allocation7 + $0x1c]] }
  0x88   :  { %v346_v16 = vmul.f32 %v345_v9, %v344_v12  ;;  %v363_v18 = vmul.f32 %v362_v15, %v680_v0  ;;  %v364_v19 = vstv %s523_s28  ;;  %s529_s1 = sld [smem:[#allocation8 + $0x1c]] }
  0x89   :  { %v355_v20 = vmax.f32 %v354_v14, 0.0  ;;  %s791_s9 = sld [smem:[#allocation10 + $0x1c]]  ;;  %v367_v25 = vstv %s783_s29 }
  0x8a   :  { %v347_v21 = vadd.f32 %v346_v16, %v336_v13  ;;  %v365_v22 = vadd.f32 %v364_v19, %v363_v18  ;;  %v373_v23 = vstv %s525_s30  ;;  %s531_s0 = sld [smem:[#allocation7 + $0x1d]] }
  0x8b   :  { %v357_v24 = vmul.f32 %v356_v17, %v355_v20  ;;  %v374_v26 = vmul.f32 %v373_v23, %v680_v0  ;;  %v375_v27 = vstv %s526_s6  ;;  %s532_s3 = sld [smem:[#allocation8 + $0x1d]] }
  0x8c   :  { %v366_v28 = vmax.f32 %v365_v22, 0.0  ;;  %s795_s10 = sld [smem:[#allocation10 + $0x1d]]  ;;  %v378_v33 = vstv %s787_s7 }
  0x8d   :  { %v358_v29 = vadd.f32 %v357_v24, %v347_v21  ;;  %v376_v30 = vadd.f32 %v375_v27, %v374_v26  ;;  %v384_v31 = vstv %s528_s8  ;;  %s534_s11 = sld [smem:[#allocation7 + $0x1e]] }
  0x8e   :  { %v368_v32 = vmul.f32 %v367_v25, %v366_v28  ;;  %v385_v34 = vmul.f32 %v384_v31, %v680_v0  ;;  %v386_v35 = vstv %s529_s1  ;;  %s535_s12 = sld [smem:[#allocation8 + $0x1e]] }
  0x8f   :  { %v377_v36 = vmax.f32 %v376_v30, 0.0  ;;  %s536_s13 = sld [smem:[#allocation10 + $0x1e]]  ;;  %v389_v41 = vstv %s791_s9 }
  0x90   :  { %v369_v37 = vadd.f32 %v368_v32, %v358_v29  ;;  %v387_v38 = vadd.f32 %v386_v35, %v385_v34  ;;  %v395_v39 = vstv %s531_s0  ;;  %s537_s14 = sld [smem:[#allocation7 + $0x1f]] }
  0x91   :  { %v379_v40 = vmul.f32 %v378_v33, %v377_v36  ;;  %v396_v42 = vmul.f32 %v395_v39, %v680_v0  ;;  %v397_v43 = vstv %s532_s3  ;;  %s538_s15 = sld [smem:[#allocation8 + $0x1f]] }
  0x92   :  { %v388_v44 = vmax.f32 %v387_v38, 0.0  ;;  %s539_s16 = sld [smem:[#allocation10 + $0x1f]]  ;;  %v400_v49 = vstv %s795_s10 }
  0x93   :  { %v380_v45 = vadd.f32 %v379_v40, %v369_v37  ;;  %v398_v46 = vadd.f32 %v397_v43, %v396_v42  ;;  %v406_v47 = vstv %s534_s11 }
  0x94   :  { %v390_v48 = vmul.f32 %v389_v41, %v388_v44  ;;  %v407_v50 = vmul.f32 %v406_v47, %v680_v0  ;;  %v408_v51 = vstv %s535_s12 }
  0x95   :  { %v399_v52 = vmax.f32 %v398_v46, 0.0  ;;  %v411_v57 = vstv %s536_s13 }
  0x96   :  { %v391_v53 = vadd.f32 %v390_v48, %v380_v45  ;;  %v409_v54 = vadd.f32 %v408_v51, %v407_v50  ;;  %v417_v55 = vstv %s537_s14 }
  0x97   :  { %v401_v56 = vmul.f32 %v400_v49, %v399_v52  ;;  %v418_v58 = vmul.f32 %v417_v55, %v680_v0  ;;  %v419_v59 = vstv %s538_s15 }
  0x98   :  { %v410_v60 = vmax.f32 %v409_v54, 0.0  ;;  %v422_v1 = vstv %s539_s16 }
  0x99   :  { %v402_v61 = vadd.f32 %v401_v56, %v391_v53  ;;  %v420_v62 = vadd.f32 %v419_v59, %v418_v58 }
  0x9a   :  { %v412_v63 = vmul.f32 %v411_v57, %v410_v60 }
  0x9b   :  { %v421_v2 = vmax.f32 %v420_v62, 0.0 }
  0x9c   :  { %v413_v3 = vadd.f32 %v412_v63, %v402_v61 }
  0x9d   :  { %v423_v4 = vmul.f32 %v422_v1, %v421_v2 }
  0x9f   :  { %v424_v5 = vadd.f32 %v423_v4, %v413_v3 }
  0xa1   :  { %v425_v6 = vmul.f32 1.442695, %v424_v5 }
  0xa3   :  { %545 = vpow2.f32 %v425_v6 }
  0xb0   :  { %v546_v7 = vpop.eup %545 }
  0xb1   :  { %v427_v8 = vadd.f32 1.0, %v546_v7 }
  0xb3   :  { %547 = vrcp.f32 %v427_v8 }
  0xc0   :  { %v548_v9 = vpop.eup %547 }
  0xc1   :  { %429 = vst [vmem:[#allocation11] sm:$0xff] %v548_v9 }
  0xc2   :  { %616 = shalt.err (!%p613_p10)
}
  0xc3   :  { %439 = dma.vmem_to_hbm [thread:$0]  %s437_s18, 128, %s812_s5, [#allocation5]  }
  0xc4   :  { %631 = dma.done.wait [#allocation5], 128  }
  0xc5   :  { %632 = vsyncadd [#allocation5], 4294967168 }
  0xc6   :  { %443 = vsyncpa [#allocation4], 1 }
  0xc7   :  { %444 = vsyncpa [#allocation5], 1 }
  0xc8   :  { %445 = vsyncpa [#allocation6], 1 }
  0xc9   :  { %446 = vsyncpa [#allocation9], 1 }

</bundles_post_ra>
